<compile_context>
chip_gen: v7x
topology: tpu7x:2x2x1
jax: 0.10.0
libtpu: 0.0.40
codegen_flags: <defaults>
</compile_context>

<pallas_src>
import math

import jax
import jax.numpy as jnp
from jax.experimental import pallas as pl
from jax.experimental.pallas import tpu as pltpu


_LANES = 1024                   # lane-dense last dim (multiple of 128) -> unmasked vst
_TARGET_BLOCK_BYTES = 2 << 20   # ~2 MiB blocks: near HBM roofline, fits all VMEM budgets


def _linreg_kernel(w_ref, b_ref, x_ref, o_ref):
    # w_ref / b_ref are (1,) scalars in SMEM; x_ref / o_ref are (block_rows, _LANES) VMEM tiles.
    o_ref[...] = w_ref[0] * x_ref[...] + b_ref[0]


def _pick_block_rows(n_rows, row_bytes):
    """Rows per block: whole array when small, else ~2 MiB blocks (multiple of 8 rows)."""
    total_bytes = n_rows * row_bytes
    if n_rows <= 8 or total_bytes <= (512 << 10):
        # Tiny input: one full-array block, grid=(1,), no inter-step DMA bookkeeping.
        return n_rows
    block = max(8, min(n_rows, _TARGET_BLOCK_BYTES // row_bytes))
    block = (block // 8) * 8
    # Keep >= 2 grid steps so a parallel grid axis can shard across both v7x TensorCores.
    if pl.cdiv(n_rows, block) < 2:
        block = max(8, (n_rows // 2 // 8) * 8)
    return block


def linear_regression_forward(x, weights, bias):
    """y = weights * x + bias with scalar weights/bias broadcast over x (any shape)."""
    orig_shape = x.shape
    dtype = x.dtype
    total = math.prod(orig_shape) if orig_shape else 1

    # Present a lane-dense 2-D slab to the kernel regardless of the caller's shape.
    flat = x.reshape(-1)
    pad = (-total) % _LANES
    if pad:
        flat = jnp.concatenate([flat, jnp.zeros((pad,), dtype)])
    n_rows = flat.shape[0] // _LANES
    x2 = flat.reshape(n_rows, _LANES)

    row_bytes = _LANES * jnp.dtype(dtype).itemsize
    block_rows = _pick_block_rows(n_rows, row_bytes)
    grid = (pl.cdiv(n_rows, block_rows),)

    out2 = pl.pallas_call(
        _linreg_kernel,
        out_shape=jax.ShapeDtypeStruct((n_rows, _LANES), dtype),
        grid_spec=pltpu.PrefetchScalarGridSpec(
            num_scalar_prefetch=0,
            grid=grid,
            in_specs=[
                pl.BlockSpec(memory_space=pltpu.MemorySpace.SMEM),    # weights (1,)
                pl.BlockSpec(memory_space=pltpu.MemorySpace.SMEM),    # bias    (1,)
                pl.BlockSpec((block_rows, _LANES), lambda i: (i, 0)),  # x tile
            ],
            out_specs=pl.BlockSpec((block_rows, _LANES), lambda i: (i, 0)),
        ),
        compiler_params=pltpu.CompilerParams(
            dimension_semantics=("parallel",),
        ),
    )(weights, bias, x2)

    out_flat = out2.reshape(-1)
    if pad:
        out_flat = out_flat[:total]
    return out_flat.reshape(orig_shape)


if __name__ == "__main__":
    key = jax.random.PRNGKey(0)
    kx, kw, kb = jax.random.split(key, 3)

    # Small example input consistent with the module (elementwise over any shape).
    x = jax.random.normal(kx, (32, 128), dtype=jnp.float32)

    # Deterministic "parameter init" matching nn.Parameter(torch.randn(1)).
    weights = jax.random.normal(kw, (1,), dtype=jnp.float32)
    bias = jax.random.normal(kb, (1,), dtype=jnp.float32)

    y = linear_regression_forward(x, weights, bias)
    y = jax.block_until_ready(y)

    # Reference check against plain JAX (same semantics as torch forward).
    y_ref = weights * x + bias
    assert y.shape == x.shape and y.dtype == x.dtype
    assert jnp.allclose(y, y_ref, atol=1e-6, rtol=1e-6)

    # Exercise the padded + multi-block (tiled) path with a non-aligned shape.
    x_big = jax.random.normal(kx, (1000, 300), dtype=jnp.float32)
    y_big = jax.block_until_ready(linear_regression_forward(x_big, weights, bias))
    assert jnp.allclose(y_big, weights * x_big + bias, atol=1e-6, rtol=1e-6)

    print("KERNEL_OK")
</pallas_src>

<mosaic_0001>
module attributes {stable_mosaic.version = 11 : i64} {
  func.func @_linreg_kernel(%arg0: i32, %arg1: memref<1xf32, #tpu.memory_space<smem>>, %arg2: memref<1xf32, #tpu.memory_space<smem>>, %arg3: memref<4x1024xf32, #tpu.memory_space<vmem>>, %arg4: memref<4x1024xf32, #tpu.memory_space<vmem>>) attributes {dimension_semantics = [#tpu.dimension_semantics<parallel>], iteration_bounds = array<i64: 1>, scalar_prefetch = 0 : i64, scratch_operands = 0 : i64, tpu.core_type = #tpu.core_type<tc>, window_params = [{transform_indices = @transform_0, window_bounds = array<i64: 1>}, {transform_indices = @transform_1, window_bounds = array<i64: 1>}, {transform_indices = @transform_2, window_bounds = array<i64: 4, 1024>}, {transform_indices = @transform_3, window_bounds = array<i64: 4, 1024>}]} {
    %c0 = arith.constant 0 : index
    %0 = memref.load %arg1[%c0] : memref<1xf32, #tpu.memory_space<smem>>
    %c0_0 = arith.constant 0 : index
    %c0_1 = arith.constant 0 : index
    %1 = vector.load %arg3[%c0_0, %c0_1] : memref<4x1024xf32, #tpu.memory_space<vmem>>, vector<4x1024xf32>
    %2 = vector.broadcast %0 : f32 to vector<4x1024xf32>
    %3 = arith.mulf %2, %1 : vector<4x1024xf32>
    %c0_2 = arith.constant 0 : index
    %4 = memref.load %arg2[%c0_2] : memref<1xf32, #tpu.memory_space<smem>>
    %5 = vector.broadcast %4 : f32 to vector<4x1024xf32>
    %6 = arith.addf %3, %5 : vector<4x1024xf32>
    %c0_3 = arith.constant 0 : index
    %c0_4 = arith.constant 0 : index
    %7 = vector.load %arg4[%c0_3, %c0_4] : memref<4x1024xf32, #tpu.memory_space<vmem>>, vector<4x1024xf32>
    tpu.vector_store %arg4[%c0_3, %c0_4], %6 {strides = array<i32>} : memref<4x1024xf32, #tpu.memory_space<vmem>>, vector<4x1024xf32>,
    return
  }
  func.func @transform_0(%arg0: i32) -> i32 {
    %c0_i32 = arith.constant 0 : i32
    %c0_i32_0 = arith.constant 0 : i32
    return %c0_i32 : i32
  }
  func.func @transform_1(%arg0: i32) -> i32 {
    %c0_i32 = arith.constant 0 : i32
    %c0_i32_0 = arith.constant 0 : i32
    return %c0_i32 : i32
  }
  func.func @transform_2(%arg0: i32) -> (i32, i32) {
    %c0_i32 = arith.constant 0 : i32
    %c0_i32_0 = arith.constant 0 : i32
    return %arg0, %c0_i32 : i32, i32
  }
  func.func @transform_3(%arg0: i32) -> (i32, i32) {
    %c0_i32 = arith.constant 0 : i32
    %c0_i32_0 = arith.constant 0 : i32
    return %arg0, %c0_i32 : i32, i32
  }
}

</mosaic_0001>

<bundles_post_ra>
// kernel: tpu_custom_call.1
= control target key start
LH: loop header
LB: loop body
LE: loop exit
PB: predicated region body
PF: predicated region fallthrough
CT: control target
= control target key end

     0   :  { %10 = vsyncpa [#allocation5], 0  ;;  %s166_s0 = inlined_call_operand.<no memory space> [shape: f32[1], index: 0, kind: input, shape index: {}]   ;;  %s167_s1 = inlined_call_operand.<no memory space> [shape: f32[1], index: 1, kind: input, shape index: {}]   ;;  %s168_s2 = inlined_call_operand.hbm [shape: f32[4,1024], index: 2, kind: input, shape index: {}]   ;;  %s169_s3 = inlined_call_operand.hbm [shape: f32[4,1024], index: 3, kind: output, shape index: {}]  }
   0x1   :  { %11 = vsyncpa [#allocation6], 0  ;;  %s114_s12 = smov [#allocation4]   ;;  %s66_s16 = scalar_lea.hbm %s168_s2, 512 }
   0x2   :  { %s22_s13 = sshll.u32 %s114_s12, 4  ;;  %p67_p0 = scmp.ne.s32.totalorder %s168_s2, %s66_s16  ;;  %s23_s13 = int_to_ptr.vmem [resolvable:$true] %s22_s13 }
   0x3   :  { %p70_p1 = scmp.lt.u32.totalorder %s66_s16, %s168_s2 }
   0x5   :  { %p72_p2 = pnand %p70_p1, %p67_p0 }
   0x7   :  { %75 = shalt.err (!%p72_p2)
}
   0x8   :  { %s76_s21 = scalar_lea.vmem %s23_s13, 512  ;;  %p81_p4 = scmp.lt.s32.totalorder %s23_s13, %s23_s13 }
   0x9   :  { %p77_p3 = scmp.ne.s32.totalorder %s23_s13, %s76_s21  ;;  %p82_p5 = scmp.lt.s32.totalorder %s76_s21, %s76_s21 }
   0xb   :  { %p83_p6 = por %p82_p5, %p81_p4 }
   0xd   :  { %p84_p7 = pnand %p83_p6, %p77_p3 }
   0xf   :  { %87 = shalt.err (!%p84_p7)
}
  0x10   :  { %25 = dma.hbm_to_vmem [thread:$0]  %s168_s2, 512, %s23_s13, [#allocation5]  }
  0x11   :  { %110 = dma.done.wait [#allocation5], 512  }
  0x12   :  { %111 = vsyncadd [#allocation5], 4294966784  ;;  %v34_v0 = vstv %s166_s0  ;;  %v30_v1 = vld [vmem:[#allocation4] sm:$0xff]  ;;  %v40_v2 = vstv %s167_s1  ;;  %v31_v3 = vld [vmem:[#allocation4 + $0x8] sm:$0xff]  ;;  %s115_s28 = smov [#allocation7]  }
  0x13   :  { %v32_v4 = vld [vmem:[#allocation4 + $0x10] sm:$0xff]  ;;  %v35_v5 = vmul.f32 %v34_v0, %v30_v1  ;;  %v36_v6 = vmul.f32 %v34_v0, %v31_v3  ;;  %v33_v8 = vld [vmem:[#allocation4 + $0x18] sm:$0xff]  ;;  %s55_s29 = sshll.u32 %s115_s28, 4  ;;  %s56_s29 = int_to_ptr.vmem [resolvable:$true] %s55_s29 }
  0x14   :  { %v37_v7 = vmul.f32 %v34_v0, %v32_v4  ;;  %v38_v9 = vmul.f32 %v34_v0, %v33_v8  ;;  %s88_s0 = scalar_lea.vmem %s56_s29, 512  ;;  %p93_p9 = scmp.lt.s32.totalorder %s56_s29, %s56_s29 }
  0x15   :  { %v41_v10 = vadd.f32 %v40_v2, %v35_v5  ;;  %v42_v11 = vadd.f32 %v40_v2, %v36_v6  ;;  %p89_p8 = scmp.ne.s32.totalorder %s56_s29, %s88_s0  ;;  %p94_p10 = scmp.lt.s32.totalorder %s88_s0, %s88_s0 }
  0x16   :  { %v43_v12 = vadd.f32 %v40_v2, %v37_v7  ;;  %v44_v13 = vadd.f32 %v40_v2, %v38_v9 }
  0x17   :  { %45 = vst [vmem:[#allocation7] sm:$0xff] %v41_v10  ;;  %46 = vst [vmem:[#allocation7 + $0x8] sm:$0xff] %v42_v11  ;;  %p95_p11 = por %p94_p10, %p93_p9 }
  0x18   :  { %47 = vst [vmem:[#allocation7 + $0x10] sm:$0xff] %v43_v12  ;;  %48 = vst [vmem:[#allocation7 + $0x18] sm:$0xff] %v44_v13 }
  0x19   :  { %p96_p12 = pnand %p95_p11, %p89_p8 }
  0x1b   :  { %99 = shalt.err (!%p96_p12)
}
  0x1c   :  { %s100_s30 = scalar_lea.hbm %s169_s3, 512 }
  0x1d   :  { %p101_p13 = scmp.ne.s32.totalorder %s169_s3, %s100_s30  ;;  %p104_p0 = scmp.lt.u32.totalorder %s100_s30, %s169_s3 }
  0x1f   :  { %p106_p1 = pnand %p104_p0, %p101_p13 }
  0x21   :  { %109 = shalt.err (!%p106_p1)
}
  0x22   :  { %58 = dma.vmem_to_hbm [thread:$0]  %s56_s29, 512, %s169_s3, [#allocation6]  }
  0x23   :  { %112 = dma.done.wait [#allocation6], 512  }
  0x24   :  { %113 = vsyncadd [#allocation6], 4294966784 }
  0x25   :  { %62 = vsyncpa [#allocation5], 1 }
  0x26   :  { %63 = vsyncpa [#allocation6], 1 }

</bundles_post_ra>
